<compile_context>
chip_gen: v5e
topology: v5e:2x2
jax: 0.10.0
libtpu: 0.0.40
codegen_flags: <defaults>
</compile_context>

<pallas_src>
import functools

import jax
import jax.numpy as jnp
from jax.experimental import pallas as pl
from jax.experimental.pallas import tpu as pltpu


def _round_up(x, m):
    return ((x + m - 1) // m) * m


def _vmem_budget_bytes():
    """Generation-aware VMEM cap: ~3/4 of physical (48 MiB v7x, 96 MiB v5e/v6e)."""
    try:
        cap = int(pltpu.get_tpu_info().vmem_capacity_bytes)
    except Exception:
        cap = 64 << 20   # conservative (v7x-sized) fallback
    return (cap * 3) // 4


# --------------------------------------------------------------------------
# Batch-tiled kernel: per-tile CE and NC1 partial sums.
# --------------------------------------------------------------------------
def _nc_batch_kernel(labels_ref, y_pred_ref, feat_ref, means_ref,   # inputs
                     out_ref,                                       # (1,8,128)
                     *, batch_size, has_padding):
    pid = pl.program_id(0)
    nsteps = pl.num_programs(0)

    logits = y_pred_ref[...]          # (TM, C) f32
    x = feat_ref[...]                 # (TM, D) f32
    labels = labels_ref[...]          # (TM, 1) int32
    means = means_ref[...]            # (C, D)  f32 (resident block)

    TM, C = logits.shape

    # One-hot built in-VMEM from the int32 labels column.
    class_ids = jax.lax.broadcasted_iota(jnp.int32, (TM, C), 1)
    onehot = (class_ids == labels).astype(jnp.float32)              # (TM, C)

    # ---------------- CrossEntropyLoss per-row partials ----------------------
    m = jnp.max(logits, axis=1, keepdims=True)
    lse = m + jnp.log(jnp.sum(jnp.exp(logits - m), axis=1, keepdims=True))
    tgt = jnp.sum(logits * onehot, axis=1, keepdims=True)
    ce_rows = lse - tgt                                              # (TM, 1)

    # ---------------- NC1 (modified center loss) per-row partials ------------
    # torch: dist = (|x|^2 + |mu|^2 - 2 x mu^T) * onehot; clamp(1e-12,1e12).sum()/B
    # Gather the target mean with an exact f32 one-hot matmul (MXU) and add the
    # exact contribution of the (C-1) clamped zero entries per row.
    mu_y = jnp.dot(onehot, means, preferred_element_type=jnp.float32)  # (TM, D)
    diff = x - mu_y
    nc1_rows = (jnp.clip(jnp.sum(diff * diff, axis=1, keepdims=True), 1e-12, 1e12)
                + float(C - 1) * 1e-12)                              # (TM, 1)

    def _write(sup_p, nc1_p):
        # Lane-dense full-block store: row 0 carries the CE partial, row 1 the
        # NC1 partial (the wrapper reads lane 0 of each).
        r = jax.lax.broadcasted_iota(jnp.int32, (1, 8, 128), 1)
        out_ref[...] = jnp.where(r == 0, sup_p, jnp.where(r == 1, nc1_p, 0.0))

    if has_padding:
        is_last = pid == nsteps - 1

        @pl.when(is_last)
        def _masked():
            # Only the last tile can contain padded rows.
            row_ids = pid * TM + jax.lax.broadcasted_iota(jnp.int32, (TM, 1), 0)
            valid = (row_ids < batch_size).astype(jnp.float32)       # (TM, 1)
            _write(jnp.sum(ce_rows * valid), jnp.sum(nc1_rows * valid))

        @pl.when(jnp.logical_not(is_last))
        def _unmasked():
            _write(jnp.sum(ce_rows), jnp.sum(nc1_rows))
    else:
        _write(jnp.sum(ce_rows), jnp.sum(nc1_rows))


# --------------------------------------------------------------------------
# Means-only kernel: NC2 max pairwise cosine (runs once, separate call).
# --------------------------------------------------------------------------
def _nc2_kernel(means_ref, out_ref):
    means = means_ref[...]                                           # (C, D) f32
    g = jnp.mean(means, axis=0, keepdims=True)
    cen = means - g
    ss = jnp.sum(cen * cen, axis=1, keepdims=True)
    # F.normalize(eps=1e-12): v / max(||v||, 1e-12) == v * rsqrt(max(ss, 1e-24))
    normed = cen * jax.lax.rsqrt(jnp.maximum(ss, 1e-24))
    # bf16 inputs run the MXU at native rate on all generations; f32 accumulate.
    nb = normed.astype(jnp.bfloat16)
    cosine = jax.lax.dot_general(
        nb, nb,
        dimension_numbers=(((1,), (1,)), ((), ())),
        preferred_element_type=jnp.float32)                          # (C, C)
    K = cosine.shape[0]
    r = jax.lax.broadcasted_iota(jnp.int32, (K, K), 0)
    c = jax.lax.broadcasted_iota(jnp.int32, (K, K), 1)
    # torch's `cosine - 2*diag(diag(cosine))` just knocks the diagonal to ~-1;
    # for the max a masked select is equivalent and avoids building eye.
    cosine = jnp.where(r == c, -1.0, cosine)
    # Clamp on BOTH sides so arccos in the epilogue never has infinite gradient.
    out_ref[0] = jnp.clip(jnp.max(cosine), -0.99999, 0.99999)


# --------------------------------------------------------------------------
# Wrapper
# --------------------------------------------------------------------------
def nc_loss(y_pred, labels, features, means,
            lambda1=0.1, lambda2=0.05, lambda_CE=1.0, block_rows=None):
    B, C = y_pred.shape
    D = features.shape[1]
    assert means.shape == (C, D)

    budget = _vmem_budget_bytes()

    def est_bytes(tm):
        tiles = 2 * tm * (C + D + 1) * 4        # double-buffered logits/features/labels
        means_b = 2 * C * D * 4                 # resident means (worst-case 2 buffers)
        interm = tm * (3 * C + 2 * D) * 4       # onehot / exp / diff live values (rough)
        out = 2 * 8 * 128 * 4
        return tiles + means_b + interm + out + (2 << 20)

    # Adaptive batch tile: largest multiple-of-8 tile (<=1024) that fits the
    # budget; shrink the tile rather than clipping the VMEM limit.
    b8 = _round_up(B, 8)
    max_tm = min(1024, b8)
    if block_rows is not None:
        max_tm = min(max_tm, max(8, _round_up(block_rows, 8)))
    cands = sorted({c for c in (8, 16, 32, 64, 128, 256, 512, 1024) if c <= max_tm}
                   | ({b8} if b8 <= max_tm else set()), reverse=True)
    tm = 8
    for c in cands:
        if est_bytes(c) <= budget:
            tm = c
            break
    b_pad = _round_up(B, tm)
    n_tiles = b_pad // tm
    vmem_limit = int(min(max(2 * est_bytes(tm), 16 << 20), budget))

    y_pred_p = y_pred.astype(jnp.float32)
    feats_p = features.astype(jnp.float32)
    labels_p = labels.astype(jnp.int32).reshape(B, 1)
    means_f = means.astype(jnp.float32)
    if b_pad != B:
        pad = ((0, b_pad - B), (0, 0))
        y_pred_p = jnp.pad(y_pred_p, pad)
        feats_p = jnp.pad(feats_p, pad)
        labels_p = jnp.pad(labels_p, pad)

    kernel = functools.partial(_nc_batch_kernel, batch_size=B,
                               has_padding=(b_pad != B))

    partials = pl.pallas_call(
        kernel,
        grid=(n_tiles,),
        in_specs=[
            pl.BlockSpec((tm, 1), lambda i: (i, 0)),   # labels (int32 column)
            pl.BlockSpec((tm, C), lambda i: (i, 0)),   # logits
            pl.BlockSpec((tm, D), lambda i: (i, 0)),   # features
            pl.BlockSpec((C, D), lambda i: (0, 0)),    # means (resident)
        ],
        out_specs=pl.BlockSpec((1, 8, 128), lambda i: (i, 0, 0)),
        out_shape=jax.ShapeDtypeStruct((n_tiles, 8, 128), jnp.float32),
        compiler_params=pltpu.CompilerParams(
            dimension_semantics=("parallel",),          # megacore-shardable batch axis
            vmem_limit_bytes=vmem_limit),
    )(labels_p, y_pred_p, feats_p, means_f)

    inv_b = 1.0 / float(B)
    sup_loss = jnp.sum(partials[:, 0, 0]) * inv_b
    nc1_loss = jnp.sum(partials[:, 1, 0]) * inv_b

    # NC2 runs once on the (C, D) means in its own tiny kernel so the (C, C)
    # intermediates never touch the batch kernel's VMEM footprint.
    nc2_vmem = int(min(max(4 * C * D * 4 + 2 * C * C * 4 + (4 << 20), 16 << 20),
                       budget))
    max_cosine = pl.pallas_call(
        _nc2_kernel,
        grid=(1,),
        in_specs=[pl.BlockSpec((C, D), lambda i: (0, 0))],
        out_specs=pl.BlockSpec(memory_space=pltpu.MemorySpace.SMEM),
        out_shape=jax.ShapeDtypeStruct((1,), jnp.float32),
        compiler_params=pltpu.CompilerParams(
            dimension_semantics=("arbitrary",),
            vmem_limit_bytes=nc2_vmem),
    )(means_f)[0]

    # scalar epilogue: NC2 loss = -acos(max_cosine); weighted sum is O(1).
    nc2_loss = -jnp.arccos(max_cosine)
    loss = lambda_CE * sup_loss + lambda1 * nc1_loss + lambda2 * nc2_loss
    return loss, (sup_loss, nc1_loss, nc2_loss, max_cosine, means)


def _reference(y_pred, labels, features, means):
    """Pure-JAX reference mirroring the torch module (for validation)."""
    B, C = y_pred.shape
    onehot = jax.nn.one_hot(labels, C, dtype=jnp.float32)
    logz = jax.nn.log_softmax(y_pred, axis=-1)
    sup = -jnp.mean(jnp.sum(logz * onehot, axis=-1))

    distmat = (jnp.sum(features ** 2, axis=1, keepdims=True)
               + jnp.sum(means ** 2, axis=1)[None, :]
               - 2.0 * features @ means.T)
    dist = distmat * onehot
    nc1 = jnp.clip(dist, 1e-12, 1e12).sum() / B

    g = means.mean(axis=0, keepdims=True)
    cen = means - g
    normed = cen / jnp.maximum(
        jnp.sqrt(jnp.sum(cen ** 2, axis=1, keepdims=True)), 1e-12)
    cosine = normed @ normed.T
    cosine = cosine - 2.0 * jnp.diag(jnp.diag(cosine))
    max_cos = jnp.clip(jnp.max(cosine), -0.99999, 0.99999)
    nc2 = -jnp.arccos(max_cos)
    return sup, nc1, nc2, max_cos


if __name__ == "__main__":
    lam1, lam2, lam_ce = 0.1, 0.05, 1.0

    # Case 1: small shapes consistent with the module's forward signature.
    B, C, D = 8, 16, 32
    key = jax.random.PRNGKey(0)
    k1, k2, k3, k4, k5, k6 = jax.random.split(key, 6)
    y_pred = jax.random.normal(k1, (B, C), dtype=jnp.float32)
    labels = jax.random.randint(k2, (B,), 0, C, dtype=jnp.int32)
    features = jax.random.normal(k3, (B, D), dtype=jnp.float32)
    means = jax.random.normal(k4, (C, D), dtype=jnp.float32)

    loss, (sup_l, nc1_l, nc2_l, max_cos, _) = nc_loss(
        y_pred, labels, features, means,
        lambda1=lam1, lambda2=lam2, lambda_CE=lam_ce)
    jax.block_until_ready(loss)

    sup_r, nc1_r, nc2_r, mc_r = _reference(y_pred, labels, features, means)
    loss_r = lam_ce * sup_r + lam1 * nc1_r + lam2 * nc2_r
    assert bool(jnp.isfinite(loss)), "loss is not finite"
    assert bool(jnp.allclose(sup_l, sup_r, rtol=5e-3, atol=5e-3))
    assert bool(jnp.allclose(nc1_l, nc1_r, rtol=5e-3, atol=5e-3))
    # NC2 Gram matmul runs in bf16 (f32 accumulate) -> slightly looser tolerance.
    assert bool(jnp.allclose(max_cos, mc_r, rtol=1e-2, atol=1e-2))
    assert bool(jnp.allclose(loss, loss_r, rtol=5e-3, atol=5e-3))

    # Case 2: non-multiple batch + multi-tile grid (exercises padding/masking,
    # the per-tile partial outputs, and the last-tile-only mask branch).
    B2 = 20
    y_pred2 = jax.random.normal(k5, (B2, C), dtype=jnp.float32)
    labels2 = jax.random.randint(k6, (B2,), 0, C, dtype=jnp.int32)
    features2 = jax.random.normal(k3, (B2, D), dtype=jnp.float32)

    loss2, (sup2, nc12, nc22, mc2, _) = nc_loss(
        y_pred2, labels2, features2, means,
        lambda1=lam1, lambda2=lam2, lambda_CE=lam_ce, block_rows=8)
    jax.block_until_ready(loss2)

    sup_r2, nc1_r2, nc2_r2, mc_r2 = _reference(y_pred2, labels2, features2, means)
    loss_r2 = lam_ce * sup_r2 + lam1 * nc1_r2 + lam2 * nc2_r2
    assert bool(jnp.isfinite(loss2)), "loss2 is not finite"
    assert bool(jnp.allclose(sup2, sup_r2, rtol=5e-3, atol=5e-3))
    assert bool(jnp.allclose(nc12, nc1_r2, rtol=5e-3, atol=5e-3))
    assert bool(jnp.allclose(mc2, mc_r2, rtol=1e-2, atol=1e-2))
    assert bool(jnp.allclose(loss2, loss_r2, rtol=5e-3, atol=5e-3))

    print("KERNEL_OK")
</pallas_src>

<mosaic_0001>
module attributes {stable_mosaic.version = 11 : i64} {
  func.func @_nc_batch_kernel(%arg0: i32, %arg1: memref<8x1xi32, #tpu.memory_space<vmem>>, %arg2: memref<8x16xf32, #tpu.memory_space<vmem>>, %arg3: memref<8x32xf32, #tpu.memory_space<vmem>>, %arg4: memref<16x32xf32, #tpu.memory_space<vmem>>, %arg5: memref<1x8x128xf32, #tpu.memory_space<vmem>>) attributes {dimension_semantics = [#tpu.dimension_semantics<parallel>], iteration_bounds = array<i64: 1>, scalar_prefetch = 0 : i64, scratch_operands = 0 : i64, tpu.core_type = #tpu.core_type<tc>, window_params = [{transform_indices = @transform_0, window_bounds = array<i64: 8, 1>}, {transform_indices = @transform_1, window_bounds = array<i64: 8, 16>}, {transform_indices = @transform_2, window_bounds = array<i64: 8, 32>}, {pipeline_mode = #tpu.pipeline_mode<synchronous>, transform_indices = @transform_3, window_bounds = array<i64: 16, 32>}, {transform_indices = @transform_4, window_bounds = array<i64: 1, 8, 128>}]} {
    %c0 = arith.constant 0 : index
    %c0_0 = arith.constant 0 : index
    %0 = vector.load %arg2[%c0, %c0_0] : memref<8x16xf32, #tpu.memory_space<vmem>>, vector<8x16xf32>
    %c0_1 = arith.constant 0 : index
    %c0_2 = arith.constant 0 : index
    %1 = vector.load %arg3[%c0_1, %c0_2] : memref<8x32xf32, #tpu.memory_space<vmem>>, vector<8x32xf32>
    %c0_3 = arith.constant 0 : index
    %c0_4 = arith.constant 0 : index
    %2 = vector.load %arg1[%c0_3, %c0_4] : memref<8x1xi32, #tpu.memory_space<vmem>>, vector<8x1xi32>
    %c0_5 = arith.constant 0 : index
    %c0_6 = arith.constant 0 : index
    %3 = vector.load %arg4[%c0_5, %c0_6] : memref<16x32xf32, #tpu.memory_space<vmem>>, vector<16x32xf32>
    %4 = tpu.iota {dimensions = array<i32: 1>} : vector<8x16xi32>
    %5 = vector.broadcast %2 : vector<8x1xi32> to vector<8x16xi32>
    %6 = arith.cmpi eq, %4, %5 : vector<8x16xi32>
    %7 = arith.extui %6 : vector<8x16xi1> to vector<8x16xi32>
    %8 = arith.sitofp %7 : vector<8x16xi32> to vector<8x16xf32>
    %cst = arith.constant dense<0xFF800000> : vector<8xf32>
    %9 = vector.multi_reduction <maximumf>, %0, %cst [1] : vector<8x16xf32> to vector<8xf32>
    %10 = vector.shape_cast %9 : vector<8xf32> to vector<8x1xf32>
    %11 = vector.broadcast %10 : vector<8x1xf32> to vector<8x16xf32>
    %12 = arith.subf %0, %11 : vector<8x16xf32>
    %13 = math.exp %12 : vector<8x16xf32>
    %cst_7 = arith.constant dense<0.000000e+00> : vector<8xf32>
    %14 = vector.multi_reduction <add>, %13, %cst_7 [1] : vector<8x16xf32> to vector<8xf32>
    %15 = vector.shape_cast %14 : vector<8xf32> to vector<8x1xf32>
    %16 = math.log %15 : vector<8x1xf32>
    %17 = arith.addf %10, %16 : vector<8x1xf32>
    %18 = arith.mulf %0, %8 : vector<8x16xf32>
    %cst_8 = arith.constant dense<0.000000e+00> : vector<8xf32>
    %19 = vector.multi_reduction <add>, %18, %cst_8 [1] : vector<8x16xf32> to vector<8xf32>
    %20 = vector.shape_cast %19 : vector<8xf32> to vector<8x1xf32>
    %21 = arith.subf %17, %20 : vector<8x1xf32>
    %cst_9 = arith.constant dense<0.000000e+00> : vector<8x32xf32>
    %22 = tpu.matmul %8, %3, %cst_9 {dimension_numbers = #tpu.dot_dimension_numbers<[1], [0], [0], [1], [0, 0, 1, 1], [], []>} : vector<8x16xf32>, vector<16x32xf32>, vector<8x32xf32> -> vector<8x32xf32>
    %23 = arith.subf %1, %22 : vector<8x32xf32>
    %24 = arith.mulf %23, %23 : vector<8x32xf32>
    %cst_10 = arith.constant dense<0.000000e+00> : vector<8xf32>
    %25 = vector.multi_reduction <add>, %24, %cst_10 [1] : vector<8x32xf32> to vector<8xf32>
    %26 = vector.shape_cast %25 : vector<8xf32> to vector<8x1xf32>
    %cst_11 = arith.constant 9.99999996E-13 : f32
    %cst_12 = arith.constant 9.99999995E+11 : f32
    %27 = vector.broadcast %cst_11 : f32 to vector<8x1xf32>
    %28 = arith.maximumf %27, %26 : vector<8x1xf32>
    %29 = vector.broadcast %cst_12 : f32 to vector<8x1xf32>
    %30 = arith.minimumf %29, %28 : vector<8x1xf32>
    %cst_13 = arith.constant 1.500000e-11 : f32
    %31 = vector.broadcast %cst_13 : f32 to vector<8x1xf32>
    %32 = arith.addf %30, %31 : vector<8x1xf32>
    %33 = vector.shape_cast %21 : vector<8x1xf32> to vector<1x8x1xf32>
    %cst_14 = arith.constant dense<0.000000e+00> : vector<1xf32>
    %34 = vector.multi_reduction <add>, %33, %cst_14 [1, 2] : vector<1x8x1xf32> to vector<1xf32>
    %35 = vector.shape_cast %34 : vector<1xf32> to vector<1x1x1xf32>
    %36 = vector.extract %35[0, 0, 0] : f32 from vector<1x1x1xf32>
    %37 = vector.shape_cast %32 : vector<8x1xf32> to vector<1x8x1xf32>
    %cst_15 = arith.constant dense<0.000000e+00> : vector<1xf32>
    %38 = vector.multi_reduction <add>, %37, %cst_15 [1, 2] : vector<1x8x1xf32> to vector<1xf32>
    %39 = vector.shape_cast %38 : vector<1xf32> to vector<1x1x1xf32>
    %40 = vector.extract %39[0, 0, 0] : f32 from vector<1x1x1xf32>
    %41 = tpu.iota {dimensions = array<i32: 1>} : vector<1x8x128xi32>
    %c0_i32 = arith.constant 0 : i32
    %42 = vector.broadcast %c0_i32 : i32 to vector<1x8x128xi32>
    %43 = arith.cmpi eq, %41, %42 : vector<1x8x128xi32>
    %c1_i32 = arith.constant 1 : i32
    %44 = vector.broadcast %c1_i32 : i32 to vector<1x8x128xi32>
    %45 = arith.cmpi eq, %41, %44 : vector<1x8x128xi32>
    %cst_16 = arith.constant 0.000000e+00 : f32
    %46 = vector.broadcast %40 : f32 to vector<1x8x128xf32>
    %47 = vector.broadcast %cst_16 : f32 to vector<1x8x128xf32>
    %48 = arith.select %45, %46, %47 : vector<1x8x128xi1>, vector<1x8x128xf32>
    %49 = vector.broadcast %36 : f32 to vector<1x8x128xf32>
    %50 = arith.select %43, %49, %48 : vector<1x8x128xi1>, vector<1x8x128xf32>
    %c0_17 = arith.constant 0 : index
    %c0_18 = arith.constant 0 : index
    %c0_19 = arith.constant 0 : index
    %51 = vector.load %arg5[%c0_17, %c0_18, %c0_19] : memref<1x8x128xf32, #tpu.memory_space<vmem>>, vector<1x8x128xf32>
    tpu.vector_store %arg5[%c0_17, %c0_18, %c0_19], %50 {strides = array<i32>} : memref<1x8x128xf32, #tpu.memory_space<vmem>>, vector<1x8x128xf32>,
    return
  }
  func.func @transform_0(%arg0: i32) -> (i32, i32) {
    %c0_i32 = arith.constant 0 : i32
    %c0_i32_0 = arith.constant 0 : i32
    return %arg0, %c0_i32 : i32, i32
  }
  func.func @transform_1(%arg0: i32) -> (i32, i32) {
    %c0_i32 = arith.constant 0 : i32
    %c0_i32_0 = arith.constant 0 : i32
    return %arg0, %c0_i32 : i32, i32
  }
  func.func @transform_2(%arg0: i32) -> (i32, i32) {
    %c0_i32 = arith.constant 0 : i32
    %c0_i32_0 = arith.constant 0 : i32
    return %arg0, %c0_i32 : i32, i32
  }
  func.func @transform_3(%arg0: i32) -> (i32, i32) {
    %c0_i32 = arith.constant 0 : i32
    %c0_i32_0 = arith.constant 0 : i32
    %c0_i32_1 = arith.constant 0 : i32
    return %c0_i32, %c0_i32_0 : i32, i32
  }
  func.func @transform_4(%arg0: i32) -> (i32, i32, i32) {
    %c0_i32 = arith.constant 0 : i32
    %c0_i32_0 = arith.constant 0 : i32
    %c0_i32_1 = arith.constant 0 : i32
    return %arg0, %c0_i32, %c0_i32_0 : i32, i32, i32
  }
}

</mosaic_0001>

<bundles_post_ra>
// kernel: tpu_custom_call.1
= control target key start
LH: loop header
LB: loop body
LE: loop exit
PB: predicated region body
PF: predicated region fallthrough
CT: control target
= control target key end

     0   :  { %9 = vsyncpa [#allocation3], 0  ;;  %s306_s0 = inlined_call_operand.vmem [shape: s32[8,1], index: 0, kind: input, shape index: {}]   ;;  %s307_s1 = inlined_call_operand.vmem [shape: f32[8,16], index: 1, kind: input, shape index: {}]   ;;  %s308_s2 = inlined_call_operand.hbm [shape: f32[8,32], index: 2, kind: input, shape index: {}]   ;;  %s309_s3 = inlined_call_operand.hbm [shape: f32[16,32], index: 3, kind: input, shape index: {}]   ;;  %s310_s4 = inlined_call_operand.hbm [shape: f32[1,8,128], index: 4, kind: output, shape index: {}]  }
   0x1   :  { %10 = vsyncpa [#allocation6], 0 }
   0x2   :  { %11 = vsyncpa [#allocation4], 0  ;;  %s21_s17 = sshll.u32 %s308_s2, 4  ;;  %s255_s18 = smov [#allocation2]   ;;  %s22_s17 = int_to_ptr.hbm [resolvable:$true] %s21_s17 }
   0x3   :  { %s23_s19 = sshll.u32 %s255_s18, 4  ;;  %s31_s22 = sshll.u32 %s309_s3, 4  ;;  %s24_s19 = int_to_ptr.vmem [resolvable:$true] %s23_s19  ;;  %s32_s22 = int_to_ptr.hbm [resolvable:$true] %s31_s22 }
   0x4   :  { %26 = dma.hbm_to_vmem [thread:$0]  %s22_s17, 128, %s24_s19, [#allocation3]  }
   0x5   :  { %s256_s23 = smov [#allocation5]   ;;  %s257_s25 = smov 128  }
   0x6   :  { %s33_s24 = sshll.u32 %s256_s23, 4  ;;  %s258_s26 = smov 8   ;;  %s34_s24 = int_to_ptr.vmem [resolvable:$true] %s33_s24 }
   0x7   :  { %39 = dma.hbm_to_vmem [thread:$0]  %s32_s22, 256, %s34_s24, [#allocation6], %s257_s25, %s257_s25, %s258_s26  }
   0x8   :  { %249 = dma.done.wait [#allocation3], 128  }
   0x9   :  { %250 = vsyncadd [#allocation3], 4294967168 }
   0xa   :  { %251 = dma.done.wait [#allocation6], 256  }
   0xb   :  { %252 = vsyncadd [#allocation6], 4294967040  ;;  %v259_v0 = vmov 0   ;;  %v50_v1 = vld [vmem:[%s306_s0] sm:$0xff]  ;;  %v52_v2 = vld [vmem:[#allocation5 + $0x8] sm:$0xff]  ;;  %vm61_vm0 = vcmask 130048   ;;  %v53_v6 = vlaneseq }
   0xc   :  { %172 = vset.pattern.permute.xlu0 %v259_v0  ;;  %96 = vmatpush.msra.mxu0 %v52_v2  ;;  %v48_v3 = vld [vmem:[%s307_s1] sm:$0xff]  ;;  %v51_v5 = vld [vmem:[#allocation5] sm:$0xff]  ;;  %v260_v9 = vmov 0.0   ;;  %vm104_vm2 = vcmask 261120   ;;  %vm111_vm3 = vcmask 7168   ;;  %s261_s0 = smov [#allocation7]  }
   0xd   :  { %56 = vperm.xlu0 %172, %v50_v1   ;;  %v62_v4 = vsel %vm61_vm0, %v48_v3, -inf  ;;  %v54_v7 = vand.u32 127, %v53_v6  ;;  %v49_v18 = vld [vmem:[#allocation2] sm:$0xff]  ;;  %v133_v49 = vshrl.u32 %v53_v6, 7  ;;  %s146_s1 = sshll.u32 %s261_s0, 4  ;;  %s148_s6 = sshll.u32 %s310_s4, 4  ;;  %s147_s1 = int_to_ptr.vmem [resolvable:$true] %s146_s1  ;;  %s149_s6 = int_to_ptr.hbm [resolvable:$true] %s148_s6 }
   0xe   :  { %97 = vmatpush.msra.mxu0 %v51_v5 }
   0xf   :  { %vm135_vm4 = vcmp.eq.s32.totalorder %v133_v49, 1  ;;  %vm134_vm5 = vcmp.eq.s32.totalorder %v133_v49, 0 }
  0x37   :  { %63 = vmax.xlane.f32.xlu0 %v62_v4 }
  0x7f   :  { %v57_v8 = vpop.permute.xlu0 %56 }
  0x80   :  { %vm58_vm1 = vcmp.eq.s32.totalorder %v54_v7, %v57_v8 }
  0x81   :  { %v159_v10 = vsel %vm58_vm1, 1.0, %v260_v9 }
  0x82   :  { %160 = vmatmul.msk.f32.vlgmr.msra.gmra.mxu0 %vm61_vm0, %v159_v10  ;;  %v74_v11 = vmul.f32 %v159_v10, %v48_v3 }
  0x84   :  { %v75_v12 = vsel %vm61_vm0, %v74_v11, 0.0 }
  0x85   :  { %76 = vadd.xlane.f32.xlu2 %v75_v12 }
  0xaa   :  { %v64_v13 = vpop.xlane.xlu0 %63 }
  0xab   :  { %v65_v14 = vsub.f32 %v48_v3, %v64_v13 }
  0xad   :  { %v66_v15 = vmul.f32 1.442695, %v65_v14 }
  0xaf   :  { %173 = vpow2.f32 %v66_v15 }
  0xb5   :  { %v174_v16 = vpop.eup %173 }
  0xb6   :  { %v68_v17 = vsel %vm61_vm0, %v174_v16, 0.0 }
  0xb7   :  { %69 = vadd.xlane.f32.xlu1 %v68_v17 }
  0xf8   :  { %v77_v27 = vpop.xlane.xlu2 %76 }
  0xff   :  { %v99_v19 = vpop.f32.mrf.mxu0 }
 0x100   :  { %v102_v20 = vsub.f32 %v49_v18, %v99_v19 }
 0x102   :  { %v103_v21 = vmul.f32 %v102_v20, %v102_v20 }
 0x104   :  { %v105_v22 = vsel %vm104_vm2, %v103_v21, 0.0 }
 0x105   :  { %106 = vadd.xlane.f32.xlu1 %v105_v22 }
 0x12a   :  { %v70_v23 = vpop.xlane.xlu1 %69 }
 0x12b   :  { %175 = vlog2.f32 %v70_v23 }
 0x131   :  { %v176_v24 = vpop.eup %175 }
 0x132   :  { %v72_v25 = vmul.f32 0.6931472, %v176_v24 }
 0x134   :  { %v73_v26 = vadd.f32 %v72_v25, %v64_v13 }
 0x136   :  { %v78_v28 = vsub.f32 %v73_v26, %v77_v27 }
 0x138   :  { %v112_v29 = vsel %vm111_vm3, %v78_v28, 0.0 }
 0x139   :  { %113 = vadd.xlane.f32.xlu2 %v112_v29 }
 0x178   :  { %v107_v30 = vpop.xlane.xlu1 %106 }
 0x179   :  { %v108_v31 = vmax.f32 %v107_v30, 1e-12 }
 0x17b   :  { %v109_v32 = vmin.f32 %v108_v31, 1e+12 }
 0x17d   :  { %v110_v33 = vadd.f32 1.5e-11, %v109_v32 }
 0x17f   :  { %v122_v34 = vsel %vm111_vm3, %v110_v33, 0.0 }
 0x180   :  { %123 = vadd.xlane.f32.xlu1 %v122_v34 }
 0x1ac   :  { %v114_v35 = vpop.xlane.xlu2 %113 }
 0x1ad   :  { %v115_v36 = vrot.slane %v114_v35, 4 }
 0x1af   :  { %v116_v37 = vadd.f32 %v115_v36, %v114_v35 }
 0x1b1   :  { %v117_v38 = vrot.slane %v116_v37, 2 }
 0x1b3   :  { %v118_v39 = vadd.f32 %v117_v38, %v116_v37 }
 0x1b5   :  { %v119_v40 = vrot.slane %v118_v39, 1 }
 0x1b7   :  { %v120_v41 = vadd.f32 %v119_v40, %v118_v39 }
 0x1b9   :  { %161 = vpush %v120_v41 }
 0x1ea   :  { %s162_s29 = spop %161 }
 0x1eb   :  { %v138_v51 = vstv %s162_s29 }
 0x1f3   :  { %v124_v42 = vpop.xlane.xlu1 %123 }
 0x1f4   :  { %v125_v43 = vrot.slane %v124_v42, 4 }
 0x1f6   :  { %v126_v44 = vadd.f32 %v125_v43, %v124_v42 }
 0x1f8   :  { %v127_v45 = vrot.slane %v126_v44, 2 }
 0x1fa   :  { %v128_v46 = vadd.f32 %v127_v45, %v126_v44 }
 0x1fc   :  { %v129_v47 = vrot.slane %v128_v46, 1 }
 0x1fe   :  { %v130_v48 = vadd.f32 %v129_v47, %v128_v46 }
 0x200   :  { %163 = vpush %v130_v48 }
 0x231   :  { %s164_s7 = spop %163 }
 0x232   :  { %v136_v50 = vstv %s164_s7 }
 0x233   :  { %v137_v52 = vsel %vm135_vm4, %v136_v50, 0.0 }
 0x234   :  { %v139_v53 = vsel %vm134_vm5, %v138_v51, %v137_v52 }
 0x235   :  { %140 = vst [vmem:[#allocation7] sm:$0xff] %v139_v53 }
 0x236   :  { %151 = dma.vmem_to_hbm [thread:$0]  %s147_s1, 128, %s149_s6, [#allocation4]  }
 0x237   :  { %253 = dma.done.wait [#allocation4], 128  }
 0x238   :  { %254 = vsyncadd [#allocation4], 4294967168 }
 0x239   :  { %156 = vsyncpa [#allocation3], 1 }
 0x23a   :  { %157 = vsyncpa [#allocation6], 1 }
 0x23b   :  { %158 = vsyncpa [#allocation4], 1 }

</bundles_post_ra>
